<compile_context>
chip_gen: v5e
topology: v5e:2x2
jax: 0.10.0
libtpu: 0.0.40
codegen_flags: <defaults>
</compile_context>

<pallas_src>
import functools

import jax
import jax.numpy as jnp
from jax.experimental import pallas as pl
from jax.experimental.pallas import tpu as pltpu


# ---------------------------------------------------------------------------
# In-kernel helpers
# ---------------------------------------------------------------------------
def _xy_scale(shape, m, inv_w, inv_h):
    """Per-column normalization scale.

    Even columns are x-like (scaled by 1/w), odd columns y-like (1/h); the
    scale is active only when the tensor max exceeds 1.5, matching the
    PyTorch `if tensor.max() > 1.5` branch.  inv_w / inv_h are compile-time
    Python floats, so sx / sy are splat constants selected by a scalar.
    """
    sx = jnp.where(m > 1.5, jnp.float32(inv_w), jnp.float32(1.0))
    sy = jnp.where(m > 1.5, jnp.float32(inv_h), jnp.float32(1.0))
    col = jax.lax.broadcasted_iota(jnp.int32, shape, len(shape) - 1)
    return jnp.where(col % 2 == 0, sx, sy)


def _boxes_body(boxes_ref, out_ref, *, out_fmt, normalize, inv_w, inv_h):
    # Two (N, 2) halves: [x1, y1] and [x2, y2].  Full-width VPU math — no
    # per-column width-1 slices, no concatenate, no roll.
    a = boxes_ref[:, 0:2].astype(jnp.float32)
    b = boxes_ref[:, 2:4].astype(jnp.float32)

    if out_fmt == "cxcywh":
        c0 = (a + b) * 0.5          # [cx, cy]
        c1 = b - a                  # [w,  h ]
    else:
        c0, c1 = a, b               # stay xyxy

    if normalize:
        # PyTorch checks boxes.max() AFTER the format conversion and clamps
        # whenever normalize=True (even if the >1.5 branch is not taken).
        m = jnp.maximum(jnp.max(c0), jnp.max(c1))
        s = _xy_scale(c0.shape, m, inv_w, inv_h)   # [sx, sy] — same for both halves
        c0 = jnp.clip(c0 * s, 0.0, 1.0)
        c1 = jnp.clip(c1 * s, 0.0, 1.0)

    out_ref[:, 0:2] = c0
    out_ref[:, 2:4] = c1


def _landmarks_body(lm_ref, out_ref, *, normalize, inv_w, inv_h):
    lm = lm_ref[...].astype(jnp.float32)
    if normalize:
        m = jnp.max(lm)
        s = _xy_scale(lm.shape, m, inv_w, inv_h)
        lm = jnp.clip(lm * s, 0.0, 1.0)
    out_ref[...] = lm


# ---------------------------------------------------------------------------
# Kernels
# ---------------------------------------------------------------------------
def _fused_kernel(boxes_ref, lm_ref, boxes_out_ref, lm_out_ref, *,
                  out_fmt, normalize, inv_w, inv_h):
    _boxes_body(boxes_ref, boxes_out_ref, out_fmt=out_fmt,
                normalize=normalize, inv_w=inv_w, inv_h=inv_h)
    _landmarks_body(lm_ref, lm_out_ref, normalize=normalize,
                    inv_w=inv_w, inv_h=inv_h)


def _boxes_kernel(boxes_ref, out_ref, *, out_fmt, normalize, inv_w, inv_h):
    _boxes_body(boxes_ref, out_ref, out_fmt=out_fmt,
                normalize=normalize, inv_w=inv_w, inv_h=inv_h)


def _landmarks_kernel(lm_ref, out_ref, *, normalize, inv_w, inv_h):
    _landmarks_body(lm_ref, out_ref, normalize=normalize,
                    inv_w=inv_w, inv_h=inv_h)


# ---------------------------------------------------------------------------
# Pallas wrappers (jitted; w/h/flags are static -> baked into the kernel).
# The wrappers contain no data-movement ops besides the pallas_call itself.
# ---------------------------------------------------------------------------
_VMEM = pl.BlockSpec(memory_space=pltpu.VMEM)


@functools.partial(jax.jit, static_argnames=("w", "h", "out_fmt", "normalize"))
def _run_fused(boxes, landmarks, w, h, out_fmt, normalize):
    kernel = functools.partial(
        _fused_kernel, out_fmt=out_fmt, normalize=normalize,
        inv_w=1.0 / w, inv_h=1.0 / h)
    return pl.pallas_call(
        kernel,
        out_shape=(jax.ShapeDtypeStruct(boxes.shape, jnp.float32),
                   jax.ShapeDtypeStruct(landmarks.shape, jnp.float32)),
        in_specs=[_VMEM, _VMEM],
        out_specs=(_VMEM, _VMEM),
    )(boxes, landmarks)


@functools.partial(jax.jit, static_argnames=("w", "h", "out_fmt", "normalize"))
def _run_boxes(boxes, w, h, out_fmt, normalize):
    kernel = functools.partial(
        _boxes_kernel, out_fmt=out_fmt, normalize=normalize,
        inv_w=1.0 / w, inv_h=1.0 / h)
    return pl.pallas_call(
        kernel,
        out_shape=jax.ShapeDtypeStruct(boxes.shape, jnp.float32),
        in_specs=[_VMEM],
        out_specs=_VMEM,
    )(boxes)


@functools.partial(jax.jit, static_argnames=("w", "h", "normalize"))
def _run_landmarks(landmarks, w, h, normalize):
    kernel = functools.partial(
        _landmarks_kernel, normalize=normalize,
        inv_w=1.0 / w, inv_h=1.0 / h)
    return pl.pallas_call(
        kernel,
        out_shape=jax.ShapeDtypeStruct(landmarks.shape, jnp.float32),
        in_specs=[_VMEM],
        out_specs=_VMEM,
    )(landmarks)


class FixedConvertBox:
    """JAX/Pallas port of rtdetr FixedConvertBox (no learnable parameters)."""

    def __init__(self, out_fmt="", normalize=False):
        self.out_fmt = out_fmt
        self.normalize = normalize

    def __call__(self, img, target):
        if target is None:
            return (img, target)

        if isinstance(img, (jnp.ndarray, jax.Array)):
            h, w = img.shape[-2], img.shape[-1]
        else:
            w, h = img.size  # PIL-style

        w = float(w)
        h = float(h)

        has_boxes = "boxes" in target and target["boxes"].size > 0
        has_lm = "landmarks" in target and target["landmarks"].size > 0
        if not (has_boxes or has_lm):
            return (img, target)

        target = dict(target)
        if has_boxes and has_lm:
            b, lm = _run_fused(target["boxes"], target["landmarks"],
                               w, h, self.out_fmt, self.normalize)
            target["boxes"] = b
            target["landmarks"] = lm
        elif has_boxes:
            target["boxes"] = _run_boxes(target["boxes"], w, h,
                                         self.out_fmt, self.normalize)
        else:
            target["landmarks"] = _run_landmarks(target["landmarks"], w, h,
                                                 self.normalize)

        return (img, target)


# ---------------------------------------------------------------------------
# Main
# ---------------------------------------------------------------------------
if __name__ == "__main__":
    key = jax.random.PRNGKey(0)
    k_img, k_box, k_lm = jax.random.split(key, 3)

    C, H, W = 3, 16, 16
    N_BOX, N_LM_COORDS = 8, 10  # 5 landmark points -> 10 coords per row

    img = jax.random.uniform(k_img, (C, H, W), dtype=jnp.float32)

    # xyxy boxes in pixel coords (unnormalized, so the max > 1.5 branch is taken)
    x1y1 = jax.random.uniform(k_box, (N_BOX, 2), minval=0.0, maxval=8.0)
    wh_box = jax.random.uniform(k_lm, (N_BOX, 2), minval=1.0, maxval=8.0)
    boxes = jnp.concatenate([x1y1, x1y1 + wh_box], axis=-1).astype(jnp.float32)

    landmarks = jax.random.uniform(
        k_lm, (N_BOX, N_LM_COORDS), minval=0.0, maxval=16.0, dtype=jnp.float32
    )

    target = {"boxes": boxes, "landmarks": landmarks}

    transform = FixedConvertBox(out_fmt="cxcywh", normalize=True)
    out_img, out_target = transform(img, target)

    jax.block_until_ready(out_target["boxes"])
    jax.block_until_ready(out_target["landmarks"])

    # lightweight sanity check against a pure-JAX reference
    x1, y1, x2, y2 = boxes[:, 0], boxes[:, 1], boxes[:, 2], boxes[:, 3]
    ref = jnp.stack([(x1 + x2) / 2, (y1 + y2) / 2, x2 - x1, y2 - y1], axis=-1)
    ref = ref / jnp.asarray([W, H, W, H], dtype=jnp.float32)
    ref = jnp.clip(ref, 0.0, 1.0)
    assert jnp.allclose(out_target["boxes"], ref, atol=1e-6)

    ref_lm = landmarks / jnp.tile(
        jnp.asarray([W, H], dtype=jnp.float32), N_LM_COORDS // 2
    )
    ref_lm = jnp.clip(ref_lm, 0.0, 1.0)
    assert jnp.allclose(out_target["landmarks"], ref_lm, atol=1e-6)

    print("KERNEL_OK")
</pallas_src>

<mosaic_0001>
module attributes {stable_mosaic.version = 11 : i64} {
  func.func @_fused_kernel(%arg0: memref<8x4xf32, #tpu.memory_space<vmem>>, %arg1: memref<8x10xf32, #tpu.memory_space<vmem>>, %arg2: memref<8x4xf32, #tpu.memory_space<vmem>>, %arg3: memref<8x10xf32, #tpu.memory_space<vmem>>) attributes {dimension_semantics = [], scalar_prefetch = 0 : i64, scratch_operands = 0 : i64, tpu.core_type = #tpu.core_type<tc>} {
    %c0 = arith.constant 0 : index
    %c0_0 = arith.constant 0 : index
    %0 = vector.load %arg0[%c0, %c0_0] : memref<8x4xf32, #tpu.memory_space<vmem>>, vector<8x2xf32>
    %c0_1 = arith.constant 0 : index
    %c2 = arith.constant 2 : index
    %1 = vector.load %arg0[%c0_1, %c2] : memref<8x4xf32, #tpu.memory_space<vmem>>, vector<8x2xf32>
    %2 = arith.addf %0, %1 : vector<8x2xf32>
    %cst = arith.constant 5.000000e-01 : f32
    %3 = vector.broadcast %cst : f32 to vector<8x2xf32>
    %4 = arith.mulf %2, %3 : vector<8x2xf32>
    %5 = arith.subf %1, %0 : vector<8x2xf32>
    %6 = vector.shape_cast %4 : vector<8x2xf32> to vector<1x8x2xf32>
    %cst_2 = arith.constant dense<0xFF800000> : vector<1xf32>
    %7 = vector.multi_reduction <maximumf>, %6, %cst_2 [1, 2] : vector<1x8x2xf32> to vector<1xf32>
    %8 = vector.shape_cast %7 : vector<1xf32> to vector<1x1x1xf32>
    %9 = vector.extract %8[0, 0, 0] : f32 from vector<1x1x1xf32>
    %10 = vector.shape_cast %5 : vector<8x2xf32> to vector<1x8x2xf32>
    %cst_3 = arith.constant dense<0xFF800000> : vector<1xf32>
    %11 = vector.multi_reduction <maximumf>, %10, %cst_3 [1, 2] : vector<1x8x2xf32> to vector<1xf32>
    %12 = vector.shape_cast %11 : vector<1xf32> to vector<1x1x1xf32>
    %13 = vector.extract %12[0, 0, 0] : f32 from vector<1x1x1xf32>
    %14 = arith.maximumf %9, %13 : f32
    %cst_4 = arith.constant 1.500000e+00 : f32
    %15 = arith.cmpf ogt, %14, %cst_4 : f32
    %cst_5 = arith.constant 6.250000e-02 : f32
    %cst_6 = arith.constant 1.000000e+00 : f32
    %16 = arith.select %15, %cst_5, %cst_6 : f32
    %cst_7 = arith.constant 1.500000e+00 : f32
    %17 = arith.cmpf ogt, %14, %cst_7 : f32
    %cst_8 = arith.constant 6.250000e-02 : f32
    %cst_9 = arith.constant 1.000000e+00 : f32
    %18 = arith.select %17, %cst_8, %cst_9 : f32
    %19 = tpu.iota {dimensions = array<i32: 1>} : vector<8x2xi32>
    %c2_i32 = arith.constant 2 : i32
    %c0_i32 = arith.constant 0 : i32
    %20 = arith.cmpi eq, %c2_i32, %c0_i32 : i32
    %c1_i32 = arith.constant 1 : i32
    %21 = arith.select %20, %c1_i32, %c2_i32 : i32
    %22 = vector.broadcast %21 : i32 to vector<8x2xi32>
    %23 = arith.remsi %19, %22 : vector<8x2xi32>
    %c0_i32_10 = arith.constant 0 : i32
    %24 = vector.broadcast %c0_i32_10 : i32 to vector<8x2xi32>
    %25 = arith.cmpi ne, %23, %24 : vector<8x2xi32>
    %c0_i32_11 = arith.constant 0 : i32
    %26 = vector.broadcast %c0_i32_11 : i32 to vector<8x2xi32>
    %27 = arith.cmpi slt, %23, %26 : vector<8x2xi32>
    %c0_i32_12 = arith.constant 0 : i32
    %28 = arith.cmpi slt, %21, %c0_i32_12 : i32
    %29 = vector.broadcast %28 : i1 to vector<8x2xi1>
    %30 = vector.broadcast %29 : vector<8x2xi1> to vector<8x2xi1>
    %31 = arith.xori %27, %30 : vector<8x2xi1>
    %32 = arith.andi %31, %25 : vector<8x2xi1>
    %33 = vector.broadcast %21 : i32 to vector<8x2xi32>
    %34 = arith.addi %23, %33 : vector<8x2xi32>
    %35 = arith.select %32, %34, %23 : vector<8x2xi1>, vector<8x2xi32>
    %c0_i32_13 = arith.constant 0 : i32
    %36 = vector.broadcast %c0_i32_13 : i32 to vector<8x2xi32>
    %37 = arith.cmpi eq, %35, %36 : vector<8x2xi32>
    %38 = vector.broadcast %16 : f32 to vector<8x2xf32>
    %39 = vector.broadcast %18 : f32 to vector<8x2xf32>
    %40 = arith.select %37, %38, %39 : vector<8x2xi1>, vector<8x2xf32>
    %41 = arith.mulf %4, %40 : vector<8x2xf32>
    %cst_14 = arith.constant 0.000000e+00 : f32
    %cst_15 = arith.constant 1.000000e+00 : f32
    %42 = vector.broadcast %cst_14 : f32 to vector<8x2xf32>
    %43 = arith.maximumf %42, %41 : vector<8x2xf32>
    %44 = vector.broadcast %cst_15 : f32 to vector<8x2xf32>
    %45 = arith.minimumf %44, %43 : vector<8x2xf32>
    %46 = arith.mulf %5, %40 : vector<8x2xf32>
    %cst_16 = arith.constant 0.000000e+00 : f32
    %cst_17 = arith.constant 1.000000e+00 : f32
    %47 = vector.broadcast %cst_16 : f32 to vector<8x2xf32>
    %48 = arith.maximumf %47, %46 : vector<8x2xf32>
    %49 = vector.broadcast %cst_17 : f32 to vector<8x2xf32>
    %50 = arith.minimumf %49, %48 : vector<8x2xf32>
    %c0_18 = arith.constant 0 : index
    %c0_19 = arith.constant 0 : index
    %51 = vector.load %arg2[%c0_18, %c0_19] : memref<8x4xf32, #tpu.memory_space<vmem>>, vector<8x2xf32>
    tpu.vector_store %arg2[%c0_18, %c0_19], %45 {strides = array<i32>} : memref<8x4xf32, #tpu.memory_space<vmem>>, vector<8x2xf32>,
    %c0_20 = arith.constant 0 : index
    %c2_21 = arith.constant 2 : index
    %52 = vector.load %arg2[%c0_20, %c2_21] : memref<8x4xf32, #tpu.memory_space<vmem>>, vector<8x2xf32>
    tpu.vector_store %arg2[%c0_20, %c2_21], %50 {strides = array<i32>} : memref<8x4xf32, #tpu.memory_space<vmem>>, vector<8x2xf32>,
    %c0_22 = arith.constant 0 : index
    %c0_23 = arith.constant 0 : index
    %53 = vector.load %arg1[%c0_22, %c0_23] : memref<8x10xf32, #tpu.memory_space<vmem>>, vector<8x10xf32>
    %54 = vector.shape_cast %53 : vector<8x10xf32> to vector<1x8x10xf32>
    %cst_24 = arith.constant dense<0xFF800000> : vector<1xf32>
    %55 = vector.multi_reduction <maximumf>, %54, %cst_24 [1, 2] : vector<1x8x10xf32> to vector<1xf32>
    %56 = vector.shape_cast %55 : vector<1xf32> to vector<1x1x1xf32>
    %57 = vector.extract %56[0, 0, 0] : f32 from vector<1x1x1xf32>
    %cst_25 = arith.constant 1.500000e+00 : f32
    %58 = arith.cmpf ogt, %57, %cst_25 : f32
    %cst_26 = arith.constant 6.250000e-02 : f32
    %cst_27 = arith.constant 1.000000e+00 : f32
    %59 = arith.select %58, %cst_26, %cst_27 : f32
    %cst_28 = arith.constant 1.500000e+00 : f32
    %60 = arith.cmpf ogt, %57, %cst_28 : f32
    %cst_29 = arith.constant 6.250000e-02 : f32
    %cst_30 = arith.constant 1.000000e+00 : f32
    %61 = arith.select %60, %cst_29, %cst_30 : f32
    %62 = tpu.iota {dimensions = array<i32: 1>} : vector<8x10xi32>
    %c2_i32_31 = arith.constant 2 : i32
    %c0_i32_32 = arith.constant 0 : i32
    %63 = arith.cmpi eq, %c2_i32_31, %c0_i32_32 : i32
    %c1_i32_33 = arith.constant 1 : i32
    %64 = arith.select %63, %c1_i32_33, %c2_i32_31 : i32
    %65 = vector.broadcast %64 : i32 to vector<8x10xi32>
    %66 = arith.remsi %62, %65 : vector<8x10xi32>
    %c0_i32_34 = arith.constant 0 : i32
    %67 = vector.broadcast %c0_i32_34 : i32 to vector<8x10xi32>
    %68 = arith.cmpi ne, %66, %67 : vector<8x10xi32>
    %c0_i32_35 = arith.constant 0 : i32
    %69 = vector.broadcast %c0_i32_35 : i32 to vector<8x10xi32>
    %70 = arith.cmpi slt, %66, %69 : vector<8x10xi32>
    %c0_i32_36 = arith.constant 0 : i32
    %71 = arith.cmpi slt, %64, %c0_i32_36 : i32
    %72 = vector.broadcast %71 : i1 to vector<8x10xi1>
    %73 = vector.broadcast %72 : vector<8x10xi1> to vector<8x10xi1>
    %74 = arith.xori %70, %73 : vector<8x10xi1>
    %75 = arith.andi %74, %68 : vector<8x10xi1>
    %76 = vector.broadcast %64 : i32 to vector<8x10xi32>
    %77 = arith.addi %66, %76 : vector<8x10xi32>
    %78 = arith.select %75, %77, %66 : vector<8x10xi1>, vector<8x10xi32>
    %c0_i32_37 = arith.constant 0 : i32
    %79 = vector.broadcast %c0_i32_37 : i32 to vector<8x10xi32>
    %80 = arith.cmpi eq, %78, %79 : vector<8x10xi32>
    %81 = vector.broadcast %59 : f32 to vector<8x10xf32>
    %82 = vector.broadcast %61 : f32 to vector<8x10xf32>
    %83 = arith.select %80, %81, %82 : vector<8x10xi1>, vector<8x10xf32>
    %84 = arith.mulf %53, %83 : vector<8x10xf32>
    %cst_38 = arith.constant 0.000000e+00 : f32
    %cst_39 = arith.constant 1.000000e+00 : f32
    %85 = vector.broadcast %cst_38 : f32 to vector<8x10xf32>
    %86 = arith.maximumf %85, %84 : vector<8x10xf32>
    %87 = vector.broadcast %cst_39 : f32 to vector<8x10xf32>
    %88 = arith.minimumf %87, %86 : vector<8x10xf32>
    %c0_40 = arith.constant 0 : index
    %c0_41 = arith.constant 0 : index
    %89 = vector.load %arg3[%c0_40, %c0_41] : memref<8x10xf32, #tpu.memory_space<vmem>>, vector<8x10xf32>
    tpu.vector_store %arg3[%c0_40, %c0_41], %88 {strides = array<i32>} : memref<8x10xf32, #tpu.memory_space<vmem>>, vector<8x10xf32>,
    return
  }
}

</mosaic_0001>

<bundles_post_ra>
// kernel: _run_fused.1
= control target key start
LH: loop header
LB: loop body
LE: loop exit
PB: predicated region body
PF: predicated region fallthrough
CT: control target
= control target key end

     0   :  { %s177_s0 = inlined_call_operand.vmem [shape: f32[8,4], index: 0, kind: input, shape index: {}]   ;;  %s178_s1 = inlined_call_operand.vmem [shape: f32[8,10], index: 1, kind: input, shape index: {}]   ;;  %s179_s2 = inlined_call_operand.vmem [shape: f32[8,4], index: 2, kind: output, shape index: {0}]   ;;  %s180_s3 = inlined_call_operand.hbm [shape: f32[8,10], index: 3, kind: output, shape index: {1}]  }
   0x1   :  { %v14_v0 = vld [vmem:[%s177_s0] sm:$0xff] }
   0x2   :  { %9 = vsyncpa [#allocation3], 0  ;;  %s133_s14 = smov 126   ;;  %s134_s15 = smov 2   ;;  %v59_v1 = vld [vmem:[%s178_s1] sm:$0xff]  ;;  %vm60_vm0 = vcmask 80896  }
   0x3   :  { %16 = vrot.lane.b32.xlu0 %v14_v0, %s133_s14  ;;  %v61_v2 = vsel %vm60_vm0, %v59_v1, -inf  ;;  %vm25_vm1 = vcmask 15360   ;;  %vm36_vm2 = vcmask 31760   ;;  %s135_s22 = smov [#allocation2]   ;;  %s87_s26 = sshll.u32 %s180_s3, 4  ;;  %s88_s26 = int_to_ptr.hbm [resolvable:$true] %s87_s26 }
   0x4   :  { %62 = vmax.xlane.f32.xlu2 %v61_v2  ;;  %s85_s23 = sshll.u32 %s135_s22, 4  ;;  %s86_s23 = int_to_ptr.vmem [resolvable:$true] %s85_s23 }
   0xb   :  { %21 = vrot.lane.b32.xlu0 %v14_v0, %s134_s15 }
  0x75   :  { %v17_v3 = vpop.permute.xlu0 %16 }
  0x76   :  { %v19_v4 = vadd.f32 %v17_v3, %v14_v0 }
  0x77   :  { %v63_v10 = vpop.xlane.xlu2 %62 }
  0x78   :  { %v20_v5 = vmul.f32 0.5, %v19_v4  ;;  %v64_v12 = vrot.slane %v63_v10, 4 }
  0x7a   :  { %v26_v6 = vsel %vm25_vm1, %v20_v5, -inf  ;;  %v65_v15 = vmax.f32 %v63_v10, %v64_v12 }
  0x7b   :  { %27 = vmax.xlane.f32.xlu1 %v26_v6 }
  0x7c   :  { %v66_v18 = vrot.slane %v65_v15, 2 }
  0x7d   :  { %v22_v7 = vpop.permute.xlu0 %21 }
  0x7e   :  { %v24_v8 = vsub.f32 %v14_v0, %v22_v7  ;;  %v67_v24 = vmax.f32 %v65_v15, %v66_v18 }
  0x80   :  { %v37_v9 = vsel %vm36_vm2, %v24_v8, -inf  ;;  %v68_v27 = vrot.slane %v67_v24, 1 }
  0x82   :  { %v69_v30 = vmax.f32 %v67_v24, %v68_v27 }
  0x83   :  { %38 = vmax.xlane.f32.xlu1 %v37_v9 }
  0xee   :  { %v28_v11 = vpop.xlane.xlu1 %27 }
  0xef   :  { %v29_v13 = vrot.slane %v28_v11, 4 }
  0xf1   :  { %v30_v14 = vmax.f32 %v28_v11, %v29_v13 }
  0xf3   :  { %v31_v16 = vrot.slane %v30_v14, 2 }
  0xf5   :  { %v32_v17 = vmax.f32 %v30_v14, %v31_v16 }
  0xf6   :  { %v39_v19 = vpop.xlane.xlu1 %38 }
  0xf7   :  { %v40_v20 = vrot.slane %v39_v19, 4  ;;  %v33_v21 = vrot.slane %v32_v17, 1 }
  0xf9   :  { %v41_v22 = vmax.f32 %v39_v19, %v40_v20  ;;  %v34_v23 = vmax.f32 %v32_v17, %v33_v21 }
  0xfb   :  { %v42_v25 = vrot.slane %v41_v22, 2  ;;  %98 = vpush %v34_v23 }
  0xfd   :  { %v43_v26 = vmax.f32 %v41_v22, %v42_v25 }
  0xff   :  { %v44_v28 = vrot.slane %v43_v26, 1 }
 0x101   :  { %v45_v29 = vmax.f32 %v43_v26, %v44_v28 }
 0x103   :  { %100 = vpush %v45_v29 }
 0x104   :  { %102 = vpush %v69_v30 }
 0x12c   :  { %s99_s0 = spop %98 }
 0x134   :  { %s101_s1 = spop %100 }
 0x135   :  { %s47_s18 = smax.f32 %s101_s1, %s99_s0  ;;  %s103_s19 = spop %102 }
 0x136   :  { %p48_p0 = scmp.gt.f32.partialorder %s47_s18, 1.5  ;;  %p71_p1 = scmp.gt.f32.partialorder %s103_s19, 1.5 }
 0x138   :  { %s49_s20 = scalar_select %p48_p0, 0.0625, 1.0 }
 0x139   :  { %s72_s21 = scalar_select %p71_p1, 0.0625, 1.0 }
 0x13a   :  { %v50_v31 = vstv %s49_s20 }
 0x13b   :  { %v51_v32 = vmul.f32 %v50_v31, %v20_v5  ;;  %v54_v33 = vmul.f32 %v50_v31, %v24_v8  ;;  %v73_v34 = vstv %s72_s21 }
 0x13c   :  { %v74_v35 = vmul.f32 %v73_v34, %v59_v1 }
 0x13d   :  { %v52_v36 = vmax.f32 %v51_v32, 0.0  ;;  %v55_v37 = vmax.f32 %v54_v33, 0.0 }
 0x13e   :  { %v75_v38 = vmax.f32 %v74_v35, 0.0 }
 0x13f   :  { %v53_v39 = vmin.f32 %v52_v36, 1.0  ;;  %v56_v40 = vmin.f32 %v55_v37, 1.0 }
 0x140   :  { %v76_v41 = vmin.f32 %v75_v38, 1.0 }
 0x141   :  { %57 = vst.msk [vmem:[%s179_s2] sm:$0xff] %vm25_vm1, %v53_v39 }
 0x142   :  { %58 = vst.msk [vmem:[%s179_s2] sm:$0xff] %vm36_vm2, %v56_v40 }
 0x143   :  { %77 = vst.msk [vmem:[#allocation2] sm:$0xff] %vm60_vm0, %v76_v41 }
 0x144   :  { %90 = dma.vmem_to_hbm [thread:$0]  %s86_s23, 128, %s88_s26, [#allocation3]  }
 0x145   :  { %131 = dma.done.wait [#allocation3], 128  }
 0x146   :  { %132 = vsyncadd [#allocation3], 4294967168 }
 0x147   :  { %97 = vsyncpa [#allocation3], 1 }

</bundles_post_ra>
